<compile_context>
chip_gen: v7x
topology: tpu7x:2x2x1
jax: 0.10.0
libtpu: 0.0.40
codegen_flags: <defaults>
</compile_context>

<pallas_src>
import jax
import jax.numpy as jnp
from jax.experimental import pallas as pl
from jax.experimental.pallas import tpu as pltpu


# ---------------------------------------------------------------------------
# In-kernel helper: one PowerSeriesConv with the P linears fused in one matmul
# ---------------------------------------------------------------------------
def _power_series_conv(h, w_bf16, b, root, out_dim, num_powers):
    # h: [N, Cin] f32, w_bf16: [Cin, P*out] bf16, b: [1, P*out] f32, root: [P, out] f32
    xw = jnp.dot(h.astype(jnp.bfloat16), w_bf16,
                 preferred_element_type=jnp.float32) + b            # [N, P*out] f32
    y = root[0:1, :] * xw[:, 0:out_dim]                              # i = 0 term
    for i in range(1, num_powers):
        c = jnp.maximum(xw[:, i * out_dim:(i + 1) * out_dim], 0.0)   # relu
        p = c
        for _ in range(i - 1):                                       # relu(z) ** i
            p = p * c
        y = y + root[i:i + 1, :] * p
    return y


def _make_kernel(num_layers, num_powers, hidden, cout, num_rows, eps):
    inv_n = 1.0 / float(num_rows)

    def kernel(x_ref, w0_ref, b0_ref, r0_ref,
               wm_ref, bm_ref, rm_ref,
               gamma_ref, beta_ref,
               wo_ref, bo_ref, ro_ref, o_ref):
        # conv0: in_channel -> hidden
        h = _power_series_conv(x_ref[...], w0_ref[...], b0_ref[...], r0_ref[...],
                               hidden, num_powers)
        gamma = gamma_ref[...]
        beta = beta_ref[...]
        # middle layers, each followed by the SHARED BatchNorm1d
        for l in range(num_layers):                                  # static unroll
            h = _power_series_conv(h, wm_ref[l], bm_ref[l], rm_ref[l],
                                   hidden, num_powers)
            # one-pass batch statistics (training mode, biased variance), f32
            mean = jnp.sum(h, axis=0, keepdims=True) * inv_n
            var = jnp.sum(h * h, axis=0, keepdims=True) * inv_n - mean * mean
            h = gamma * (h - mean) * jax.lax.rsqrt(var + eps) + beta
        # conv_out: hidden -> out_channel
        o_ref[...] = _power_series_conv(h, wo_ref[...], bo_ref[...], ro_ref[...],
                                        cout, num_powers).astype(o_ref.dtype)

    return kernel


# ---------------------------------------------------------------------------
# Wrapper: single fused pallas_call for the whole forward pass
# ---------------------------------------------------------------------------
def power_series_kernel_forward(edge_attr, params, *, num_layers, num_powers,
                                hidden=64, eps=1e-5):
    n, cin = edge_attr.shape
    cout = params["conv_out"]["root"].shape[-1]
    assert num_layers >= 1

    kernel = _make_kernel(num_layers, num_powers, hidden, cout, n, eps)

    inputs = (edge_attr,
              params["conv0"]["w"], params["conv0"]["b"], params["conv0"]["root"],
              params["convs"]["w"], params["convs"]["b"], params["convs"]["root"],
              params["norm"]["gamma"], params["norm"]["beta"],
              params["conv_out"]["w"], params["conv_out"]["b"], params["conv_out"]["root"])

    matmul_flops = 2 * n * (cin * num_powers * hidden
                            + num_layers * hidden * num_powers * hidden
                            + hidden * num_powers * cout)
    bytes_accessed = sum(int(a.size) * a.dtype.itemsize for a in inputs) + n * cout * 4

    return pl.pallas_call(
        kernel,
        out_shape=jax.ShapeDtypeStruct((n, cout), jnp.float32),
        in_specs=[pl.BlockSpec(memory_space=pltpu.MemorySpace.VMEM)] * len(inputs),
        out_specs=pl.BlockSpec(memory_space=pltpu.MemorySpace.VMEM),
        compiler_params=pltpu.CompilerParams(vmem_limit_bytes=64 * 1024 * 1024),
        cost_estimate=pl.CostEstimate(flops=matmul_flops,
                                      transcendentals=num_layers * hidden,
                                      bytes_accessed=bytes_accessed),
    )(*inputs)


# ---------------------------------------------------------------------------
# Deterministic parameter initialization (shapes from the module __init__)
# ---------------------------------------------------------------------------
def _init_power_series_conv(key, cin, cout, num_powers):
    kw, kb, kr = jax.random.split(key, 3)
    bound = 1.0 / (cin ** 0.5)
    # num_powers x nn.Linear(cin, cout): weights stored pre-transposed [cin, cout]
    # and concatenated along the output axis -> one wide MXU matmul per conv.
    w = jax.random.uniform(kw, (cin, num_powers * cout), jnp.float32, -bound, bound)
    b = jax.random.uniform(kb, (1, num_powers * cout), jnp.float32, -bound, bound)
    rbound = 1.0 / (num_powers ** 0.5)        # torch_geometric uniform(size, root_param)
    root = jax.random.uniform(kr, (num_powers, cout), jnp.float32, -rbound, rbound)
    return {"w": w.astype(jnp.bfloat16), "b": b, "root": root}


def init_params(key, in_channel, hidden, out_channel, num_layers, num_powers):
    k0, km, ko = jax.random.split(key, 3)
    conv0 = _init_power_series_conv(k0, in_channel, hidden, num_powers)
    mids = [_init_power_series_conv(jax.random.fold_in(km, l), hidden, hidden, num_powers)
            for l in range(num_layers)]
    convs = {k: jnp.stack([m[k] for m in mids], axis=0) for k in ("w", "b", "root")}
    # BatchNorm1d(hidden) affine defaults: gamma=1, beta=0 (single shared module)
    norm = {"gamma": jnp.ones((1, hidden), jnp.float32),
            "beta": jnp.zeros((1, hidden), jnp.float32)}
    conv_out = _init_power_series_conv(ko, hidden, out_channel, num_powers)
    return {"conv0": conv0, "convs": convs, "norm": norm, "conv_out": conv_out}


if __name__ == "__main__":
    in_channel, out_channel = 8, 16
    hidden = 64                     # fixed by the module definition
    num_layers, num_powers = 2, 3
    num_edges = 32

    key = jax.random.PRNGKey(0)
    k_x, k_p = jax.random.split(key)
    edge_attr = jax.random.normal(k_x, (num_edges, in_channel), jnp.float32)
    params = init_params(k_p, in_channel, hidden, out_channel, num_layers, num_powers)

    out = power_series_kernel_forward(edge_attr, params,
                                      num_layers=num_layers,
                                      num_powers=num_powers,
                                      hidden=hidden)
    jax.block_until_ready(out)
    assert out.shape == (num_edges, out_channel)
    print("KERNEL_OK")
</pallas_src>

<mosaic_0001>
module attributes {stable_mosaic.version = 11 : i64} {
  func.func @kernel(%arg0: memref<32x8xf32, #tpu.memory_space<vmem>>, %arg1: memref<8x192xbf16, #tpu.memory_space<vmem>>, %arg2: memref<1x192xf32, #tpu.memory_space<vmem>>, %arg3: memref<3x64xf32, #tpu.memory_space<vmem>>, %arg4: memref<2x64x192xbf16, #tpu.memory_space<vmem>>, %arg5: memref<2x1x192xf32, #tpu.memory_space<vmem>>, %arg6: memref<2x3x64xf32, #tpu.memory_space<vmem>>, %arg7: memref<1x64xf32, #tpu.memory_space<vmem>>, %arg8: memref<1x64xf32, #tpu.memory_space<vmem>>, %arg9: memref<64x48xbf16, #tpu.memory_space<vmem>>, %arg10: memref<1x48xf32, #tpu.memory_space<vmem>>, %arg11: memref<3x16xf32, #tpu.memory_space<vmem>>, %arg12: memref<32x16xf32, #tpu.memory_space<vmem>>) attributes {dimension_semantics = [], scalar_prefetch = 0 : i64, scratch_operands = 0 : i64, tpu.core_type = #tpu.core_type<tc>} {
    %c0 = arith.constant 0 : index
    %c0_0 = arith.constant 0 : index
    %0 = vector.load %arg0[%c0, %c0_0] : memref<32x8xf32, #tpu.memory_space<vmem>>, vector<32x8xf32>
    %c0_1 = arith.constant 0 : index
    %c0_2 = arith.constant 0 : index
    %1 = vector.load %arg1[%c0_1, %c0_2] : memref<8x192xbf16, #tpu.memory_space<vmem>>, vector<8x192xbf16>
    %c0_3 = arith.constant 0 : index
    %c0_4 = arith.constant 0 : index
    %2 = vector.load %arg2[%c0_3, %c0_4] : memref<1x192xf32, #tpu.memory_space<vmem>>, vector<1x192xf32>
    %c0_5 = arith.constant 0 : index
    %c0_6 = arith.constant 0 : index
    %3 = vector.load %arg3[%c0_5, %c0_6] : memref<3x64xf32, #tpu.memory_space<vmem>>, vector<3x64xf32>
    %4 = arith.truncf %0 : vector<32x8xf32> to vector<32x8xbf16>
    %cst = arith.constant dense<0.000000e+00> : vector<32x192xf32>
    %5 = tpu.matmul %4, %1, %cst {dimension_numbers = #tpu.dot_dimension_numbers<[1], [0], [0], [1], [0, 0, 1, 1], [], []>} : vector<32x8xbf16>, vector<8x192xbf16>, vector<32x192xf32> -> vector<32x192xf32>
    %6 = vector.broadcast %2 : vector<1x192xf32> to vector<32x192xf32>
    %7 = arith.addf %5, %6 : vector<32x192xf32>
    %8 = vector.extract_strided_slice %3 {offsets = [0, 0], sizes = [1, 64], strides = [1, 1]} : vector<3x64xf32> to vector<1x64xf32>
    %9 = vector.extract_strided_slice %7 {offsets = [0, 0], sizes = [32, 64], strides = [1, 1]} : vector<32x192xf32> to vector<32x64xf32>
    %10 = vector.broadcast %8 : vector<1x64xf32> to vector<32x64xf32>
    %11 = arith.mulf %10, %9 : vector<32x64xf32>
    %12 = vector.extract_strided_slice %7 {offsets = [0, 64], sizes = [32, 64], strides = [1, 1]} : vector<32x192xf32> to vector<32x64xf32>
    %cst_7 = arith.constant 0.000000e+00 : f32
    %13 = vector.broadcast %cst_7 : f32 to vector<32x64xf32>
    %14 = arith.maximumf %12, %13 : vector<32x64xf32>
    %15 = vector.extract_strided_slice %3 {offsets = [1, 0], sizes = [1, 64], strides = [1, 1]} : vector<3x64xf32> to vector<1x64xf32>
    %16 = vector.broadcast %15 : vector<1x64xf32> to vector<32x64xf32>
    %17 = arith.mulf %16, %14 : vector<32x64xf32>
    %18 = arith.addf %11, %17 : vector<32x64xf32>
    %19 = vector.extract_strided_slice %7 {offsets = [0, 128], sizes = [32, 64], strides = [1, 1]} : vector<32x192xf32> to vector<32x64xf32>
    %cst_8 = arith.constant 0.000000e+00 : f32
    %20 = vector.broadcast %cst_8 : f32 to vector<32x64xf32>
    %21 = arith.maximumf %19, %20 : vector<32x64xf32>
    %22 = arith.mulf %21, %21 : vector<32x64xf32>
    %23 = vector.extract_strided_slice %3 {offsets = [2, 0], sizes = [1, 64], strides = [1, 1]} : vector<3x64xf32> to vector<1x64xf32>
    %24 = vector.broadcast %23 : vector<1x64xf32> to vector<32x64xf32>
    %25 = arith.mulf %24, %22 : vector<32x64xf32>
    %26 = arith.addf %18, %25 : vector<32x64xf32>
    %c0_9 = arith.constant 0 : index
    %c0_10 = arith.constant 0 : index
    %27 = vector.load %arg7[%c0_9, %c0_10] : memref<1x64xf32, #tpu.memory_space<vmem>>, vector<1x64xf32>
    %c0_11 = arith.constant 0 : index
    %c0_12 = arith.constant 0 : index
    %28 = vector.load %arg8[%c0_11, %c0_12] : memref<1x64xf32, #tpu.memory_space<vmem>>, vector<1x64xf32>
    %c0_13 = arith.constant 0 : index
    %c0_14 = arith.constant 0 : index
    %c0_15 = arith.constant 0 : index
    %29 = vector.load %arg4[%c0_13, %c0_14, %c0_15] : memref<2x64x192xbf16, #tpu.memory_space<vmem>>, vector<1x64x192xbf16>
    %30 = vector.shape_cast %29 : vector<1x64x192xbf16> to vector<64x192xbf16>
    %c0_16 = arith.constant 0 : index
    %c0_17 = arith.constant 0 : index
    %c0_18 = arith.constant 0 : index
    %31 = vector.load %arg5[%c0_16, %c0_17, %c0_18] : memref<2x1x192xf32, #tpu.memory_space<vmem>>, vector<1x1x192xf32>
    %32 = vector.shape_cast %31 : vector<1x1x192xf32> to vector<1x192xf32>
    %c0_19 = arith.constant 0 : index
    %c0_20 = arith.constant 0 : index
    %c0_21 = arith.constant 0 : index
    %33 = vector.load %arg6[%c0_19, %c0_20, %c0_21] : memref<2x3x64xf32, #tpu.memory_space<vmem>>, vector<1x3x64xf32>
    %34 = vector.shape_cast %33 : vector<1x3x64xf32> to vector<3x64xf32>
    %35 = arith.truncf %26 : vector<32x64xf32> to vector<32x64xbf16>
    %cst_22 = arith.constant dense<0.000000e+00> : vector<32x192xf32>
    %36 = tpu.matmul %35, %30, %cst_22 {dimension_numbers = #tpu.dot_dimension_numbers<[1], [0], [0], [1], [0, 0, 1, 1], [], []>} : vector<32x64xbf16>, vector<64x192xbf16>, vector<32x192xf32> -> vector<32x192xf32>
    %37 = vector.broadcast %32 : vector<1x192xf32> to vector<32x192xf32>
    %38 = arith.addf %36, %37 : vector<32x192xf32>
    %39 = vector.extract_strided_slice %34 {offsets = [0, 0], sizes = [1, 64], strides = [1, 1]} : vector<3x64xf32> to vector<1x64xf32>
    %40 = vector.extract_strided_slice %38 {offsets = [0, 0], sizes = [32, 64], strides = [1, 1]} : vector<32x192xf32> to vector<32x64xf32>
    %41 = vector.broadcast %39 : vector<1x64xf32> to vector<32x64xf32>
    %42 = arith.mulf %41, %40 : vector<32x64xf32>
    %43 = vector.extract_strided_slice %38 {offsets = [0, 64], sizes = [32, 64], strides = [1, 1]} : vector<32x192xf32> to vector<32x64xf32>
    %cst_23 = arith.constant 0.000000e+00 : f32
    %44 = vector.broadcast %cst_23 : f32 to vector<32x64xf32>
    %45 = arith.maximumf %43, %44 : vector<32x64xf32>
    %46 = vector.extract_strided_slice %34 {offsets = [1, 0], sizes = [1, 64], strides = [1, 1]} : vector<3x64xf32> to vector<1x64xf32>
    %47 = vector.broadcast %46 : vector<1x64xf32> to vector<32x64xf32>
    %48 = arith.mulf %47, %45 : vector<32x64xf32>
    %49 = arith.addf %42, %48 : vector<32x64xf32>
    %50 = vector.extract_strided_slice %38 {offsets = [0, 128], sizes = [32, 64], strides = [1, 1]} : vector<32x192xf32> to vector<32x64xf32>
    %cst_24 = arith.constant 0.000000e+00 : f32
    %51 = vector.broadcast %cst_24 : f32 to vector<32x64xf32>
    %52 = arith.maximumf %50, %51 : vector<32x64xf32>
    %53 = arith.mulf %52, %52 : vector<32x64xf32>
    %54 = vector.extract_strided_slice %34 {offsets = [2, 0], sizes = [1, 64], strides = [1, 1]} : vector<3x64xf32> to vector<1x64xf32>
    %55 = vector.broadcast %54 : vector<1x64xf32> to vector<32x64xf32>
    %56 = arith.mulf %55, %53 : vector<32x64xf32>
    %57 = arith.addf %49, %56 : vector<32x64xf32>
    %cst_25 = arith.constant dense<0.000000e+00> : vector<64xf32>
    %58 = vector.multi_reduction <add>, %57, %cst_25 [0] : vector<32x64xf32> to vector<64xf32>
    %59 = vector.shape_cast %58 : vector<64xf32> to vector<1x64xf32>
    %cst_26 = arith.constant 3.125000e-02 : f32
    %60 = vector.broadcast %cst_26 : f32 to vector<1x64xf32>
    %61 = arith.mulf %59, %60 : vector<1x64xf32>
    %62 = arith.mulf %57, %57 : vector<32x64xf32>
    %cst_27 = arith.constant dense<0.000000e+00> : vector<64xf32>
    %63 = vector.multi_reduction <add>, %62, %cst_27 [0] : vector<32x64xf32> to vector<64xf32>
    %64 = vector.shape_cast %63 : vector<64xf32> to vector<1x64xf32>
    %cst_28 = arith.constant 3.125000e-02 : f32
    %65 = vector.broadcast %cst_28 : f32 to vector<1x64xf32>
    %66 = arith.mulf %64, %65 : vector<1x64xf32>
    %67 = arith.mulf %61, %61 : vector<1x64xf32>
    %68 = arith.subf %66, %67 : vector<1x64xf32>
    %69 = vector.broadcast %61 : vector<1x64xf32> to vector<32x64xf32>
    %70 = arith.subf %57, %69 : vector<32x64xf32>
    %71 = vector.broadcast %27 : vector<1x64xf32> to vector<32x64xf32>
    %72 = arith.mulf %71, %70 : vector<32x64xf32>
    %cst_29 = arith.constant 9.99999974E-6 : f32
    %73 = vector.broadcast %cst_29 : f32 to vector<1x64xf32>
    %74 = arith.addf %68, %73 : vector<1x64xf32>
    %75 = math.rsqrt %74 : vector<1x64xf32>
    %76 = vector.broadcast %75 : vector<1x64xf32> to vector<32x64xf32>
    %77 = arith.mulf %72, %76 : vector<32x64xf32>
    %78 = vector.broadcast %28 : vector<1x64xf32> to vector<32x64xf32>
    %79 = arith.addf %77, %78 : vector<32x64xf32>
    %c1 = arith.constant 1 : index
    %c0_30 = arith.constant 0 : index
    %c0_31 = arith.constant 0 : index
    %80 = vector.load %arg4[%c1, %c0_30, %c0_31] : memref<2x64x192xbf16, #tpu.memory_space<vmem>>, vector<1x64x192xbf16>
    %81 = vector.shape_cast %80 : vector<1x64x192xbf16> to vector<64x192xbf16>
    %c1_32 = arith.constant 1 : index
    %c0_33 = arith.constant 0 : index
    %c0_34 = arith.constant 0 : index
    %82 = vector.load %arg5[%c1_32, %c0_33, %c0_34] : memref<2x1x192xf32, #tpu.memory_space<vmem>>, vector<1x1x192xf32>
    %83 = vector.shape_cast %82 : vector<1x1x192xf32> to vector<1x192xf32>
    %c1_35 = arith.constant 1 : index
    %c0_36 = arith.constant 0 : index
    %c0_37 = arith.constant 0 : index
    %84 = vector.load %arg6[%c1_35, %c0_36, %c0_37] : memref<2x3x64xf32, #tpu.memory_space<vmem>>, vector<1x3x64xf32>
    %85 = vector.shape_cast %84 : vector<1x3x64xf32> to vector<3x64xf32>
    %86 = arith.truncf %79 : vector<32x64xf32> to vector<32x64xbf16>
    %cst_38 = arith.constant dense<0.000000e+00> : vector<32x192xf32>
    %87 = tpu.matmul %86, %81, %cst_38 {dimension_numbers = #tpu.dot_dimension_numbers<[1], [0], [0], [1], [0, 0, 1, 1], [], []>} : vector<32x64xbf16>, vector<64x192xbf16>, vector<32x192xf32> -> vector<32x192xf32>
    %88 = vector.broadcast %83 : vector<1x192xf32> to vector<32x192xf32>
    %89 = arith.addf %87, %88 : vector<32x192xf32>
    %90 = vector.extract_strided_slice %85 {offsets = [0, 0], sizes = [1, 64], strides = [1, 1]} : vector<3x64xf32> to vector<1x64xf32>
    %91 = vector.extract_strided_slice %89 {offsets = [0, 0], sizes = [32, 64], strides = [1, 1]} : vector<32x192xf32> to vector<32x64xf32>
    %92 = vector.broadcast %90 : vector<1x64xf32> to vector<32x64xf32>
    %93 = arith.mulf %92, %91 : vector<32x64xf32>
    %94 = vector.extract_strided_slice %89 {offsets = [0, 64], sizes = [32, 64], strides = [1, 1]} : vector<32x192xf32> to vector<32x64xf32>
    %cst_39 = arith.constant 0.000000e+00 : f32
    %95 = vector.broadcast %cst_39 : f32 to vector<32x64xf32>
    %96 = arith.maximumf %94, %95 : vector<32x64xf32>
    %97 = vector.extract_strided_slice %85 {offsets = [1, 0], sizes = [1, 64], strides = [1, 1]} : vector<3x64xf32> to vector<1x64xf32>
    %98 = vector.broadcast %97 : vector<1x64xf32> to vector<32x64xf32>
    %99 = arith.mulf %98, %96 : vector<32x64xf32>
    %100 = arith.addf %93, %99 : vector<32x64xf32>
    %101 = vector.extract_strided_slice %89 {offsets = [0, 128], sizes = [32, 64], strides = [1, 1]} : vector<32x192xf32> to vector<32x64xf32>
    %cst_40 = arith.constant 0.000000e+00 : f32
    %102 = vector.broadcast %cst_40 : f32 to vector<32x64xf32>
    %103 = arith.maximumf %101, %102 : vector<32x64xf32>
    %104 = arith.mulf %103, %103 : vector<32x64xf32>
    %105 = vector.extract_strided_slice %85 {offsets = [2, 0], sizes = [1, 64], strides = [1, 1]} : vector<3x64xf32> to vector<1x64xf32>
    %106 = vector.broadcast %105 : vector<1x64xf32> to vector<32x64xf32>
    %107 = arith.mulf %106, %104 : vector<32x64xf32>
    %108 = arith.addf %100, %107 : vector<32x64xf32>
    %cst_41 = arith.constant dense<0.000000e+00> : vector<64xf32>
    %109 = vector.multi_reduction <add>, %108, %cst_41 [0] : vector<32x64xf32> to vector<64xf32>
    %110 = vector.shape_cast %109 : vector<64xf32> to vector<1x64xf32>
    %cst_42 = arith.constant 3.125000e-02 : f32
    %111 = vector.broadcast %cst_42 : f32 to vector<1x64xf32>
    %112 = arith.mulf %110, %111 : vector<1x64xf32>
    %113 = arith.mulf %108, %108 : vector<32x64xf32>
    %cst_43 = arith.constant dense<0.000000e+00> : vector<64xf32>
    %114 = vector.multi_reduction <add>, %113, %cst_43 [0] : vector<32x64xf32> to vector<64xf32>
    %115 = vector.shape_cast %114 : vector<64xf32> to vector<1x64xf32>
    %cst_44 = arith.constant 3.125000e-02 : f32
    %116 = vector.broadcast %cst_44 : f32 to vector<1x64xf32>
    %117 = arith.mulf %115, %116 : vector<1x64xf32>
    %118 = arith.mulf %112, %112 : vector<1x64xf32>
    %119 = arith.subf %117, %118 : vector<1x64xf32>
    %120 = vector.broadcast %112 : vector<1x64xf32> to vector<32x64xf32>
    %121 = arith.subf %108, %120 : vector<32x64xf32>
    %122 = vector.broadcast %27 : vector<1x64xf32> to vector<32x64xf32>
    %123 = arith.mulf %122, %121 : vector<32x64xf32>
    %cst_45 = arith.constant 9.99999974E-6 : f32
    %124 = vector.broadcast %cst_45 : f32 to vector<1x64xf32>
    %125 = arith.addf %119, %124 : vector<1x64xf32>
    %126 = math.rsqrt %125 : vector<1x64xf32>
    %127 = vector.broadcast %126 : vector<1x64xf32> to vector<32x64xf32>
    %128 = arith.mulf %123, %127 : vector<32x64xf32>
    %129 = vector.broadcast %28 : vector<1x64xf32> to vector<32x64xf32>
    %130 = arith.addf %128, %129 : vector<32x64xf32>
    %c0_46 = arith.constant 0 : index
    %c0_47 = arith.constant 0 : index
    %131 = vector.load %arg9[%c0_46, %c0_47] : memref<64x48xbf16, #tpu.memory_space<vmem>>, vector<64x48xbf16>
    %c0_48 = arith.constant 0 : index
    %c0_49 = arith.constant 0 : index
    %132 = vector.load %arg10[%c0_48, %c0_49] : memref<1x48xf32, #tpu.memory_space<vmem>>, vector<1x48xf32>
    %c0_50 = arith.constant 0 : index
    %c0_51 = arith.constant 0 : index
    %133 = vector.load %arg11[%c0_50, %c0_51] : memref<3x16xf32, #tpu.memory_space<vmem>>, vector<3x16xf32>
    %134 = arith.truncf %130 : vector<32x64xf32> to vector<32x64xbf16>
    %cst_52 = arith.constant dense<0.000000e+00> : vector<32x48xf32>
    %135 = tpu.matmul %134, %131, %cst_52 {dimension_numbers = #tpu.dot_dimension_numbers<[1], [0], [0], [1], [0, 0, 1, 1], [], []>} : vector<32x64xbf16>, vector<64x48xbf16>, vector<32x48xf32> -> vector<32x48xf32>
    %136 = vector.broadcast %132 : vector<1x48xf32> to vector<32x48xf32>
    %137 = arith.addf %135, %136 : vector<32x48xf32>
    %138 = vector.extract_strided_slice %133 {offsets = [0, 0], sizes = [1, 16], strides = [1, 1]} : vector<3x16xf32> to vector<1x16xf32>
    %139 = vector.extract_strided_slice %137 {offsets = [0, 0], sizes = [32, 16], strides = [1, 1]} : vector<32x48xf32> to vector<32x16xf32>
    %140 = vector.broadcast %138 : vector<1x16xf32> to vector<32x16xf32>
    %141 = arith.mulf %140, %139 : vector<32x16xf32>
    %142 = vector.extract_strided_slice %137 {offsets = [0, 16], sizes = [32, 16], strides = [1, 1]} : vector<32x48xf32> to vector<32x16xf32>
    %cst_53 = arith.constant 0.000000e+00 : f32
    %143 = vector.broadcast %cst_53 : f32 to vector<32x16xf32>
    %144 = arith.maximumf %142, %143 : vector<32x16xf32>
    %145 = vector.extract_strided_slice %133 {offsets = [1, 0], sizes = [1, 16], strides = [1, 1]} : vector<3x16xf32> to vector<1x16xf32>
    %146 = vector.broadcast %145 : vector<1x16xf32> to vector<32x16xf32>
    %147 = arith.mulf %146, %144 : vector<32x16xf32>
    %148 = arith.addf %141, %147 : vector<32x16xf32>
    %149 = vector.extract_strided_slice %137 {offsets = [0, 32], sizes = [32, 16], strides = [1, 1]} : vector<32x48xf32> to vector<32x16xf32>
    %cst_54 = arith.constant 0.000000e+00 : f32
    %150 = vector.broadcast %cst_54 : f32 to vector<32x16xf32>
    %151 = arith.maximumf %149, %150 : vector<32x16xf32>
    %152 = arith.mulf %151, %151 : vector<32x16xf32>
    %153 = vector.extract_strided_slice %133 {offsets = [2, 0], sizes = [1, 16], strides = [1, 1]} : vector<3x16xf32> to vector<1x16xf32>
    %154 = vector.broadcast %153 : vector<1x16xf32> to vector<32x16xf32>
    %155 = arith.mulf %154, %152 : vector<32x16xf32>
    %156 = arith.addf %148, %155 : vector<32x16xf32>
    %c0_55 = arith.constant 0 : index
    %c0_56 = arith.constant 0 : index
    %157 = vector.load %arg12[%c0_55, %c0_56] : memref<32x16xf32, #tpu.memory_space<vmem>>, vector<32x16xf32>
    tpu.vector_store %arg12[%c0_55, %c0_56], %156 {strides = array<i32>} : memref<32x16xf32, #tpu.memory_space<vmem>>, vector<32x16xf32>,
    return
  }
}

</mosaic_0001>

<bundles_post_ra>
// kernel: tpu_custom_call.1
= control target key start
LH: loop header
LB: loop body
LE: loop exit
PB: predicated region body
PF: predicated region fallthrough
CT: control target
= control target key end

     0   :  { %17 = vsyncpa [#allocation3], 0  ;;  %s1797_s0 = inlined_call_operand.hbm [shape: f32[32,8], index: 0, kind: input, shape index: {}]   ;;  %s1798_s1 = inlined_call_operand.hbm [shape: bf16[8,192], index: 1, kind: input, shape index: {}]   ;;  %s1799_s2 = inlined_call_operand.hbm [shape: f32[1,192], index: 2, kind: input, shape index: {}]   ;;  %s1800_s3 = inlined_call_operand.hbm [shape: f32[3,64], index: 3, kind: input, shape index: {}]   ;;  %s1801_s4 = inlined_call_operand.hbm [shape: bf16[2,64,192], index: 4, kind: input, shape index: {}]   ;;  %s1802_s5 = inlined_call_operand.hbm [shape: f32[2,1,192], index: 5, kind: input, shape index: {}]   ;;  %s1803_s6 = inlined_call_operand.hbm [shape: f32[2,3,64], index: 6, kind: input, shape index: {}]   ;;  %s1804_s7 = inlined_call_operand.hbm [shape: f32[1,64], index: 7, kind: input, shape index: {}]   ;;  %s1805_s8 = inlined_call_operand.hbm [shape: f32[1,64], index: 8, kind: input, shape index: {}]   ;;  %s1806_s9 = inlined_call_operand.hbm [shape: bf16[64,48], index: 9, kind: input, shape index: {}]   ;;  %s1807_s10 = inlined_call_operand.hbm [shape: f32[1,48], index: 10, kind: input, shape index: {}]   ;;  %s1808_s11 = inlined_call_operand.hbm [shape: f32[3,16], index: 11, kind: input, shape index: {}]   ;;  %s1809_s12 = inlined_call_operand.hbm [shape: f32[32,16], index: 12, kind: output, shape index: {}]  }
   0x1   :  { %18 = vsyncpa [#allocation6], 0 }
   0x2   :  { %19 = vsyncpa [#allocation9], 0 }
   0x3   :  { %20 = vsyncpa [#allocation12], 0 }
   0x4   :  { %21 = vsyncpa [#allocation15], 0 }
   0x5   :  { %22 = vsyncpa [#allocation18], 0 }
   0x6   :  { %23 = vsyncpa [#allocation21], 0 }
   0x7   :  { %24 = vsyncpa [#allocation4], 0  ;;  %s1437_s21 = smov [#allocation5]   ;;  %s1438_s23 = smov [#allocation8]  }
   0x8   :  { %s43_s22 = sshll.u32 %s1437_s21, 4  ;;  %s63_s24 = sshll.u32 %s1438_s23, 4  ;;  %s44_s22 = int_to_ptr.vmem [resolvable:$true] %s43_s22  ;;  %s64_s24 = int_to_ptr.vmem [resolvable:$true] %s63_s24 }
   0x9   :  { %s1135_s27 = scalar_lea.hbm %s1798_s1, 128 }
   0xa   :  { %p1136_p0 = scmp.ne.s32.totalorder %s1798_s1, %s1135_s27  ;;  %p1139_p1 = scmp.lt.u32.totalorder %s1135_s27, %s1798_s1 }
   0xc   :  { %p1141_p2 = pnand %p1139_p1, %p1136_p0 }
   0xe   :  { %1144 = shalt.err (!%p1141_p2)
}
   0xf   :  { %s1145_s14 = scalar_lea.vmem %s44_s22, 128  ;;  %p1150_p4 = scmp.lt.s32.totalorder %s44_s22, %s44_s22 }
  0x10   :  { %p1146_p3 = scmp.ne.s32.totalorder %s44_s22, %s1145_s14  ;;  %p1151_p5 = scmp.lt.s32.totalorder %s1145_s14, %s1145_s14 }
  0x12   :  { %p1152_p6 = por %p1151_p5, %p1150_p4 }
  0x14   :  { %p1153_p7 = pnand %p1152_p6, %p1146_p3 }
  0x16   :  { %1156 = shalt.err (!%p1153_p7)
}
  0x17   :  { %46 = dma.hbm_to_vmem [thread:$0]  %s1798_s1, 128, %s44_s22, [#allocation6]  }
  0x18   :  { %s1157_s19 = scalar_lea.hbm %s1800_s3, 64 }
  0x19   :  { %p1158_p8 = scmp.ne.s32.totalorder %s1800_s3, %s1157_s19  ;;  %p1161_p9 = scmp.lt.u32.totalorder %s1157_s19, %s1800_s3 }
  0x1b   :  { %p1163_p10 = pnand %p1161_p9, %p1158_p8 }
  0x1d   :  { %1166 = shalt.err (!%p1163_p10)
}
  0x1e   :  { %s1167_s26 = scalar_lea.vmem %s64_s24, 64  ;;  %p1172_p12 = scmp.lt.s32.totalorder %s64_s24, %s64_s24 }
  0x1f   :  { %p1168_p11 = scmp.ne.s32.totalorder %s64_s24, %s1167_s26  ;;  %p1173_p13 = scmp.lt.s32.totalorder %s1167_s26, %s1167_s26 }
  0x21   :  { %p1174_p0 = por %p1173_p13, %p1172_p12 }
  0x23   :  { %p1175_p1 = pnand %p1174_p0, %p1168_p11 }
  0x25   :  { %1178 = shalt.err (!%p1175_p1)
}
  0x26   :  { %66 = dma.hbm_to_vmem [thread:$0]  %s1800_s3, 64, %s64_s24, [#allocation9]  }
  0x27   :  { %s1439_s27 = smov [#allocation11]   ;;  %s1179_s13 = scalar_lea.hbm %s1802_s5, 64 }
  0x28   :  { %s84_s28 = sshll.u32 %s1439_s27, 4  ;;  %p1180_p2 = scmp.ne.s32.totalorder %s1802_s5, %s1179_s13  ;;  %s85_s28 = int_to_ptr.vmem [resolvable:$true] %s84_s28 }
  0x29   :  { %p1183_p3 = scmp.lt.u32.totalorder %s1179_s13, %s1802_s5 }
  0x2b   :  { %p1185_p4 = pnand %p1183_p3, %p1180_p2 }
  0x2d   :  { %1188 = shalt.err (!%p1185_p4)
}
  0x2e   :  { %s1189_s18 = scalar_lea.vmem %s85_s28, 64  ;;  %p1194_p6 = scmp.lt.s32.totalorder %s85_s28, %s85_s28 }
  0x2f   :  { %p1190_p5 = scmp.ne.s32.totalorder %s85_s28, %s1189_s18  ;;  %p1195_p7 = scmp.lt.s32.totalorder %s1189_s18, %s1189_s18 }
  0x31   :  { %p1196_p8 = por %p1195_p7, %p1194_p6 }
  0x33   :  { %p1197_p9 = pnand %p1196_p8, %p1190_p5 }
  0x35   :  { %1200 = shalt.err (!%p1197_p9)
}
  0x36   :  { %s1440_s3 = smov 32   ;;  %s1441_s24 = smov 2  }
  0x37   :  { %90 = dma.hbm_to_vmem [thread:$0]  %s1802_s5, 64, %s85_s28, [#allocation12], %s1440_s3, %s1440_s3, %s1441_s24  }
  0x38   :  { %s1442_s21 = smov [#allocation14]   ;;  %s1201_s1 = scalar_lea.hbm %s1804_s7, 16 }
  0x39   :  { %s109_s23 = sshll.u32 %s1442_s21, 4  ;;  %p1202_p10 = scmp.ne.s32.totalorder %s1804_s7, %s1201_s1  ;;  %s110_s23 = int_to_ptr.vmem [resolvable:$true] %s109_s23 }
  0x3a   :  { %p1205_p11 = scmp.lt.u32.totalorder %s1201_s1, %s1804_s7 }
  0x3c   :  { %p1207_p12 = pnand %p1205_p11, %p1202_p10 }
  0x3e   :  { %1210 = shalt.err (!%p1207_p12)
}
  0x3f   :  { %s1211_s13 = scalar_lea.vmem %s110_s23, 16  ;;  %s1215_s5 = scalar_lea.vmem %s110_s23, 32 }
  0x40   :  { %p1212_p13 = scmp.ne.s32.totalorder %s110_s23, %s1211_s13  ;;  %p1216_p0 = scmp.lt.s32.totalorder %s110_s23, %s110_s23 }
  0x41   :  { %p1217_p1 = scmp.lt.s32.totalorder %s1215_s5, %s1211_s13 }
  0x43   :  { %p1218_p2 = por %p1217_p1, %p1216_p0 }
  0x45   :  { %p1219_p3 = pnand %p1218_p2, %p1212_p13 }
  0x47   :  { %1222 = shalt.err (!%p1219_p3)
}
  0x48   :  { %112 = dma.hbm_to_vmem [thread:$0]  %s1804_s7, 16, %s110_s23, [#allocation15]  }
  0x49   :  { %s1443_s15 = smov [#allocation17]   ;;  %s1444_s17 = smov [#allocation2]  }
  0x4a   :  { %s128_s16 = sshll.u32 %s1443_s15, 4  ;;  %s30_s18 = sshll.u32 %s1444_s17, 4  ;;  %s129_s16 = int_to_ptr.vmem [resolvable:$true] %s128_s16  ;;  %s1572_s18 = int_to_ptr.vmem [resolvable:$true] %s30_s18 }
  0x4b   :  { %s1223_s19 = scalar_lea.hbm %s1806_s9, 512 }
  0x4c   :  { %p1224_p4 = scmp.ne.s32.totalorder %s1806_s9, %s1223_s19  ;;  %p1227_p5 = scmp.lt.u32.totalorder %s1223_s19, %s1806_s9 }
  0x4e   :  { %p1229_p6 = pnand %p1227_p5, %p1224_p4 }
  0x50   :  { %1232 = shalt.err (!%p1229_p6)
}
  0x51   :  { %s1233_s7 = scalar_lea.vmem %s129_s16, 512  ;;  %p1238_p8 = scmp.lt.s32.totalorder %s129_s16, %s129_s16 }
  0x52   :  { %p1234_p7 = scmp.ne.s32.totalorder %s129_s16, %s1233_s7  ;;  %p1239_p9 = scmp.lt.s32.totalorder %s1233_s7, %s1233_s7 }
  0x54   :  { %p1240_p10 = por %p1239_p9, %p1238_p8 }
  0x56   :  { %p1241_p11 = pnand %p1240_p10, %p1234_p7 }
  0x58   :  { %1244 = shalt.err (!%p1241_p11)
}
  0x59   :  { %s1445_s23 = smov 64   ;;  %s1446_s1 = smov 4  }
  0x5a   :  { %134 = dma.hbm_to_vmem [thread:$0]  %s1806_s9, 512, %s129_s16, [#allocation18], %s1445_s23, %s1445_s23, %s1446_s1  }
  0x5b   :  { %s1245_s13 = scalar_lea.hbm %s1797_s0, 512 }
  0x5c   :  { %p1246_p12 = scmp.ne.s32.totalorder %s1797_s0, %s1245_s13  ;;  %p1249_p13 = scmp.lt.u32.totalorder %s1245_s13, %s1797_s0 }
  0x5e   :  { %p1251_p0 = pnand %p1249_p13, %p1246_p12 }
  0x60   :  { %1254 = shalt.err (!%p1251_p0)
}
  0x61   :  { %s1255_s17 = scalar_lea.vmem %s1572_s18, 512  ;;  %p1260_p2 = scmp.lt.s32.totalorder %s1572_s18, %s1572_s18 }
  0x62   :  { %p1256_p1 = scmp.ne.s32.totalorder %s1572_s18, %s1255_s17  ;;  %p1261_p3 = scmp.lt.s32.totalorder %s1255_s17, %s1255_s17 }
  0x64   :  { %p1262_p4 = por %p1261_p3, %p1260_p2 }
  0x66   :  { %p1263_p5 = pnand %p1262_p4, %p1256_p1 }
  0x68   :  { %1266 = shalt.err (!%p1263_p5)
}
  0x69   :  { %s1447_s9 = smov 128   ;;  %s1448_s16 = smov 8  }
  0x6a   :  { %36 = dma.hbm_to_vmem [thread:$0]  %s1797_s0, 512, %s1572_s18, [#allocation3], %s1447_s9, %s1447_s9, %s1448_s16  }
  0x6b   :  { %s1449_s19 = smov [#allocation7]   ;;  %s1450_s21 = smov [#allocation10]  }
  0x6c   :  { %s53_s20 = sshll.u32 %s1449_s19, 4  ;;  %s72_s25 = sshll.u32 %s1450_s21, 4  ;;  %s54_s20 = int_to_ptr.vmem [resolvable:$true] %s53_s20  ;;  %s1609_s25 = int_to_ptr.vmem [resolvable:$true] %s72_s25 }
  0x6d   :  { %s1267_s22 = scalar_lea.hbm %s1799_s2, 32 }
  0x6e   :  { %p1268_p6 = scmp.ne.s32.totalorder %s1799_s2, %s1267_s22  ;;  %p1271_p7 = scmp.lt.u32.totalorder %s1267_s22, %s1799_s2 }
  0x70   :  { %p1273_p8 = pnand %p1271_p7, %p1268_p6 }
  0x72   :  { %1276 = shalt.err (!%p1273_p8)
}
  0x73   :  { %s1277_s0 = scalar_lea.vmem %s54_s20, 32  ;;  %p1282_p10 = scmp.lt.s32.totalorder %s54_s20, %s54_s20 }
  0x74   :  { %p1278_p9 = scmp.ne.s32.totalorder %s54_s20, %s1277_s0  ;;  %p1283_p11 = scmp.lt.s32.totalorder %s1277_s0, %s1277_s0 }
  0x76   :  { %p1284_p12 = por %p1283_p11, %p1282_p10 }
  0x78   :  { %p1285_p13 = pnand %p1284_p12, %p1278_p9 }
  0x7a   :  { %1288 = shalt.err (!%p1285_p13)
}
  0x7b   :  { %56 = dma.hbm_to_vmem [thread:$0]  %s1799_s2, 32, %s54_s20, [#allocation6]  }
  0x7c   :  { %s1289_s15 = scalar_lea.hbm %s1801_s4, 2048 }
  0x7d   :  { %p1290_p0 = scmp.ne.s32.totalorder %s1801_s4, %s1289_s15  ;;  %p1293_p1 = scmp.lt.u32.totalorder %s1289_s15, %s1801_s4 }
  0x7f   :  { %p1295_p2 = pnand %p1293_p1, %p1290_p0 }
  0x81   :  { %1298 = shalt.err (!%p1295_p2)
}
  0x82   :  { %s1299_s21 = scalar_lea.vmem %s1609_s25, 2048  ;;  %p1304_p4 = scmp.lt.s32.totalorder %s1609_s25, %s1609_s25 }
  0x83   :  { %p1300_p3 = scmp.ne.s32.totalorder %s1609_s25, %s1299_s21  ;;  %p1305_p5 = scmp.lt.s32.totalorder %s1299_s21, %s1299_s21 }
  0x85   :  { %p1306_p6 = por %p1305_p5, %p1304_p4 }
  0x87   :  { %p1307_p7 = pnand %p1306_p6, %p1300_p3 }
  0x89   :  { %1310 = shalt.err (!%p1307_p7)
}
  0x8a   :  { %78 = dma.hbm_to_vmem [thread:$0]  %s1801_s4, 2048, %s1609_s25, [#allocation9], %s1447_s9, %s1447_s9, %s1448_s16  }
  0x8b   :  { %s1451_s26 = smov [#allocation13]   ;;  %s1452_s22 = smov [#allocation16]  }
  0x8c   :  { %s96_s7 = sshll.u32 %s1451_s26, 4  ;;  %s119_s27 = sshll.u32 %s1452_s22, 4  ;;  %s97_s7 = int_to_ptr.vmem [resolvable:$true] %s96_s7  ;;  %s120_s27 = int_to_ptr.vmem [resolvable:$true] %s119_s27 }
  0x8d   :  { %s1311_s13 = scalar_lea.hbm %s1803_s6, 128 }
  0x8e   :  { %p1312_p8 = scmp.ne.s32.totalorder %s1803_s6, %s1311_s13  ;;  %p1315_p9 = scmp.lt.u32.totalorder %s1311_s13, %s1803_s6 }
  0x90   :  { %p1317_p10 = pnand %p1315_p9, %p1312_p8 }
  0x92   :  { %1320 = shalt.err (!%p1317_p10)
}
  0x93   :  { %s1321_s4 = scalar_lea.vmem %s97_s7, 128  ;;  %p1326_p12 = scmp.lt.s32.totalorder %s97_s7, %s97_s7 }
  0x94   :  { %p1322_p11 = scmp.ne.s32.totalorder %s97_s7, %s1321_s4  ;;  %p1327_p13 = scmp.lt.s32.totalorder %s1321_s4, %s1321_s4 }
  0x96   :  { %p1328_p0 = por %p1327_p13, %p1326_p12 }
  0x98   :  { %p1329_p1 = pnand %p1328_p0, %p1322_p11 }
  0x9a   :  { %1332 = shalt.err (!%p1329_p1)
}
  0x9b   :  { %102 = dma.hbm_to_vmem [thread:$0]  %s1803_s6, 128, %s97_s7, [#allocation12], %s1445_s23, %s1445_s23, %s1446_s1  }
  0x9c   :  { %s1333_s3 = scalar_lea.hbm %s1805_s8, 16 }
  0x9d   :  { %p1334_p2 = scmp.ne.s32.totalorder %s1805_s8, %s1333_s3  ;;  %p1337_p3 = scmp.lt.u32.totalorder %s1333_s3, %s1805_s8 }
  0x9f   :  { %p1339_p4 = pnand %p1337_p3, %p1334_p2 }
  0xa1   :  { %1342 = shalt.err (!%p1339_p4)
}
  0xa2   :  { %s1343_s20 = scalar_lea.vmem %s120_s27, 16  ;;  %s1347_s26 = scalar_lea.vmem %s120_s27, 32 }
  0xa3   :  { %p1344_p5 = scmp.ne.s32.totalorder %s120_s27, %s1343_s20  ;;  %p1348_p6 = scmp.lt.s32.totalorder %s120_s27, %s120_s27 }
  0xa4   :  { %p1349_p7 = scmp.lt.s32.totalorder %s1347_s26, %s1343_s20 }
  0xa6   :  { %p1350_p8 = por %p1349_p7, %p1348_p6 }
  0xa8   :  { %p1351_p9 = pnand %p1350_p8, %p1344_p5 }
  0xaa   :  { %1354 = shalt.err (!%p1351_p9)
}
  0xab   :  { %122 = dma.hbm_to_vmem [thread:$0]  %s1805_s8, 16, %s120_s27, [#allocation15]  }
  0xac   :  { %s1453_s7 = smov [#allocation19]   ;;  %s1454_s29 = smov [#allocation20]  }
  0xad   :  { %s141_s22 = sshll.u32 %s1453_s7, 4  ;;  %s151_s30 = sshll.u32 %s1454_s29, 4  ;;  %s142_s22 = int_to_ptr.vmem [resolvable:$true] %s141_s22  ;;  %s152_s30 = int_to_ptr.vmem [resolvable:$true] %s151_s30 }
  0xae   :  { %s1355_s18 = scalar_lea.hbm %s1807_s10, 16 }
  0xaf   :  { %p1356_p10 = scmp.ne.s32.totalorder %s1807_s10, %s1355_s18  ;;  %p1359_p11 = scmp.lt.u32.totalorder %s1355_s18, %s1807_s10 }
  0xb1   :  { %p1361_p12 = pnand %p1359_p11, %p1356_p10 }
  0xb3   :  { %1364 = shalt.err (!%p1361_p12)
}
  0xb4   :  { %s1365_s8 = scalar_lea.vmem %s142_s22, 16  ;;  %s1369_s27 = scalar_lea.vmem %s142_s22, 32 }
  0xb5   :  { %p1366_p13 = scmp.ne.s32.totalorder %s142_s22, %s1365_s8  ;;  %p1370_p0 = scmp.lt.s32.totalorder %s142_s22, %s142_s22 }
  0xb6   :  { %p1371_p1 = scmp.lt.s32.totalorder %s1369_s27, %s1365_s8 }
  0xb8   :  { %p1372_p2 = por %p1371_p1, %p1370_p0 }
  0xba   :  { %p1373_p3 = pnand %p1372_p2, %p1366_p13 }
  0xbc   :  { %1376 = shalt.err (!%p1373_p3)
}
  0xbd   :  { %144 = dma.hbm_to_vmem [thread:$0]  %s1807_s10, 16, %s142_s22, [#allocation18]  }
  0xbe   :  { %s1377_s24 = scalar_lea.hbm %s1808_s11, 64 }
  0xbf   :  { %p1378_p4 = scmp.ne.s32.totalorder %s1808_s11, %s1377_s24  ;;  %p1381_p5 = scmp.lt.u32.totalorder %s1377_s24, %s1808_s11 }
  0xc1   :  { %p1383_p6 = pnand %p1381_p5, %p1378_p4 }
  0xc3   :  { %1386 = shalt.err (!%p1383_p6)
}
  0xc4   :  { %s1387_s26 = scalar_lea.vmem %s152_s30, 64  ;;  %p1392_p8 = scmp.lt.s32.totalorder %s152_s30, %s152_s30 }
  0xc5   :  { %p1388_p7 = scmp.ne.s32.totalorder %s152_s30, %s1387_s26  ;;  %p1393_p9 = scmp.lt.s32.totalorder %s1387_s26, %s1387_s26 }
  0xc7   :  { %p1394_p10 = por %p1393_p9, %p1392_p8 }
  0xc9   :  { %p1395_p11 = pnand %p1394_p10, %p1388_p7 }
  0xcb   :  { %1398 = shalt.err (!%p1395_p11)
}
  0xcc   :  { %154 = dma.hbm_to_vmem [thread:$0]  %s1808_s11, 64, %s152_s30, [#allocation21]  }
  0xcd   :  { %1421 = dma.done.wait [#allocation3], 512  }
  0xce   :  { %1422 = vsyncadd [#allocation3], 4294966784 }
  0xcf   :  { %1423 = dma.done.wait [#allocation6], 160  }
  0xd0   :  { %1424 = vsyncadd [#allocation6], 4294967136 }
  0xd1   :  { %1425 = dma.done.wait [#allocation9], 2112  }
  0xd2   :  { %1426 = vsyncadd [#allocation9], 4294965184 }
  0xd3   :  { %1427 = dma.done.wait [#allocation12], 192  }
  0xd4   :  { %1428 = vsyncadd [#allocation12], 4294967104 }
  0xd5   :  { %1429 = dma.done.wait [#allocation15], 32  }
  0xd6   :  { %1430 = vsyncadd [#allocation15], 4294967264 }
  0xd7   :  { %1431 = dma.done.wait [#allocation18], 528  }
  0xd8   :  { %1432 = vsyncadd [#allocation18], 4294966768 }
  0xd9   :  { %1433 = dma.done.wait [#allocation21], 64  }
  0xda   :  { %1434 = vsyncadd [#allocation21], 4294967232  ;;  %v1455_v0 = vmov 0   ;;  %v196_v1 = vld [vmem:[#allocation5] sm:$0xff]  ;;  %vm224_vm0 = vcmask 1043456   ;;  %v193_v3 = vld [vmem:[#allocation2 + $0x8] sm:$0xff]  ;;  %v202_v13 = vlaneseq }
  0xdb   :  { %263 = vmatprep.mubr.bf16.mxu0 %v1455_v0  ;;  %448 = vmatprep.mubr.bf16.mxu1 %v1455_v0  ;;  %v192_v2 = vld [vmem:[#allocation2] sm:$0xff]  ;;  %v1028_v4 = vcombine.high %v196_v1, %v196_v1  ;;  %v1027_v5 = vcombine.low %v196_v1, %v196_v1  ;;  %vm217_vm1 = vcmask 64512   ;;  %v194_v8 = vld [vmem:[#allocation2 + $0x10] sm:$0xff]  ;;  %v195_v9 = vld [vmem:[#allocation2 + $0x18] sm:$0xff]  ;;  %vm409_vm2 = vcmask 523264   ;;  %s1456_s11 = smov 112  }
  0xdc   :  { %v199_v7 = vpack.c.bf16 %v193_v3, %v192_v2  ;;  %v200_v10 = vpack.c.bf16 %v195_v9, %v194_v8  ;;  %v1103_v11 = vld [vmem:[#allocation10 + $0x4] ss:$8 sps:$4 sm:$0xff]   ;;  %v1105_v12 = vld [vmem:[#allocation10] ss:$8 sps:$4 sm:$0xff]   ;;  %v203_v14 = vshrl.u32 %v202_v13, 7  ;;  %vm999_vm3 = vcmask 130048  }
  0xdd   :  { %1029 = vmatprep.subr.msk.bf16.mxu0 %vm224_vm0, %v1028_v4  ;;  %v226_v6 = vsel %vm224_vm0, %v1027_v5, 0  ;;  %416 = vmatprep.subr.bf16.mxu1 %v1103_v11  ;;  %v1106_v15 = vld [vmem:[#allocation10 + $0x14] ss:$8 sps:$4 sm:$0xff]   ;;  %v1108_v16 = vld [vmem:[#allocation10 + $0x10] ss:$8 sps:$4 sm:$0xff]   ;;  %s1458_s1 = smov [#allocation22]  }
  0xde   :  { %232 = vmatpush1.bf16.msra.mxu0 %v226_v6  ;;  %417 = vmatpush1.bf16.msra.mxu1 %v1105_v12  ;;  %v1698_v17 = vsub.s32 0, %v203_v14  ;;  %v197_v18 = vld [vmem:[#allocation7] sm:$0x3]  ;;  %v1109_v19 = vld [vmem:[#allocation10 + $0x24] ss:$8 sps:$4 sm:$0xff]   ;;  %v1705_v40 = vsub.s32 1, %v203_v14 }
  0xdf   :  { %418 = vmatprep.subr.bf16.mxu1 %v1106_v15  ;;  %v1111_v20 = vld [vmem:[#allocation10 + $0x20] ss:$8 sps:$4 sm:$0xff]   ;;  %v1112_v22 = vld [vmem:[#allocation10 + $0x34] ss:$8 sps:$4 sm:$0xff]   ;;  %v1114_v23 = vld [vmem:[#allocation10 + $0x30] ss:$8 sps:$4 sm:$0xff]  }
  0xe0   :  { %v205_v21 = vrot.slane %v197_v18, %v1698_v17  ;;  %v209_v41 = vrot.slane %v197_v18, %v1705_v40  ;;  %v198_v43 = vld [vmem:[#allocation8] sm:$0x7]  ;;  %v1708_v45 = vsub.s32 2, %v203_v14  ;;  %s1009_s7 = sshll.u32 %s1458_s1, 4  ;;  %s1010_s7 = int_to_ptr.vmem [resolvable:$true] %s1009_s7 }
  0xe1   :  { %1030 = vmatmul.mubr.msk.bf16.vlgmr.msra.gmra.mrb[0].mxu0 %vm217_vm1, %v199_v7  ;;  %v287_v47 = vrot.slane %v198_v43, %v1698_v17  ;;  %v299_v48 = vrot.slane %v198_v43, %v1705_v40  ;;  %s1399_s22 = scalar_lea.vmem %s1010_s7, 512  ;;  %p1404_p13 = scmp.lt.s32.totalorder %s1010_s7, %s1010_s7 }
  0xe2   :  { %273 = vmatprep.mubr.bf16.mxu0 %v1455_v0  ;;  %419 = vmatpush1.bf16.msra.mxu1 %v1108_v16  ;;  %v335_v50 = vrot.slane %v198_v43, %v1708_v45  ;;  %v1115_v43 = vld [vmem:[#allocation10 + $0x40] ss:$8 sps:$4 sm:$0xff]   ;;  %p1400_p12 = scmp.ne.s32.totalorder %s1010_s7, %s1399_s22  ;;  %p1405_p0 = scmp.lt.s32.totalorder %s1399_s22, %s1399_s22 }
  0xe3   :  { %420 = vmatprep.subr.bf16.mxu1 %v1109_v19 }
  0xe4   :  { %p1406_p1 = por %p1405_p0, %p1404_p13 }
  0xe6   :  { %421 = vmatpush1.bf16.msra.mxu1 %v1111_v20  ;;  %p1407_p2 = pnand %p1406_p1, %p1400_p12 }
  0xe7   :  { %422 = vmatprep.subr.bf16.mxu1 %v1112_v22 }
  0xe9   :  { %1031 = vmatmul.mubr.msk.bf16.gmra.mrb[4].mxu0 %vm217_vm1, %v200_v10 }
  0xea   :  { %697 = vmatprep.mubr.bf16.mxu0 %v1455_v0  ;;  %423 = vmatpush1.bf16.msra.mxu1 %v1114_v23  ;;  %v354_v23 = vld [vmem:[#allocation11] sm:$0x3] }
 0x1b4   :  { %v265_v24 = vpop.f32.mrb[0].mxu0 }
 0x1b5   :  { %v266_v25 = vadd.f32 %v265_v24, %v205_v21  ;;  %v267_v26 = vpop.f32.mrb[1].mxu0  ;;  %v362_v24 = vrot.slane %v354_v23, %v1698_v17 }
 0x1b6   :  { %v269_v27 = vpop.f32.mrb[2].mxu0  ;;  %v268_v42 = vadd.f32 %v267_v26, %v209_v41 }
 0x1b7   :  { %v270_v28 = vadd.f32 %v269_v27, %v205_v21  ;;  %v271_v29 = vpop.f32.mrb[3].mxu0  ;;  %v292_v30 = vmax.f32 %v266_v25, 0.0  ;;  %v288_v54 = vmul.f32 %v287_v47, %v266_v25 }
 0x1b8   :  { %v324_v44 = vmax.f32 %v268_v42, 0.0  ;;  %v272_v46 = vadd.f32 %v271_v29, %v209_v41  ;;  %v1117_v42 = vld [vmem:[#allocation10 + $0x44] ss:$8 sps:$4 sm:$0xff]  }
 0x1b9   :  { %304 = vrot.lane.b32.xlu0 %v292_v30, %s1445_s23  ;;  %v293_v31 = vmax.f32 %v270_v28, 0.0  ;;  %v289_v62 = vmul.f32 %v287_v47, %v270_v28  ;;  %665 = vmatprep.subr.bf16.mxu0 %v1117_v42 }
 0x1ba   :  { %v328_v49 = vmul.f32 %v324_v44, %v324_v44  ;;  %v325_v51 = vmax.f32 %v272_v46, 0.0  ;;  %v1120_v44 = vld [vmem:[#allocation10 + $0x54] ss:$8 sps:$4 sm:$0xff]   ;;  %666 = vmatpush1.bf16.msra.mxu0 %v1115_v43  ;;  %v1118_v46 = vld [vmem:[#allocation10 + $0x50] ss:$8 sps:$4 sm:$0xff]  }
 0x1bb   :  { %667 = vmatprep.subr.bf16.mxu0 %v1120_v44 }
 0x1bc   :  { %v275_v32 = vpop.f32.mrb[4].mxu0  ;;  %v336_v56 = vmul.f32 %v335_v50, %v328_v49  ;;  %v329_v57 = vmul.f32 %v325_v51, %v325_v51  ;;  %v1126_v49 = vld [vmem:[#allocation10 + $0x74] ss:$8 sps:$4 sm:$0xff]   ;;  %v366_v51 = vrot.slane %v354_v23, %v1705_v40 }
 0x1bd   :  { %v276_v33 = vadd.f32 %v275_v32, %v205_v21  ;;  %v277_v34 = vpop.f32.mrb[5].mxu0  ;;  %306 = vrot.lane.b32.xlu0 %v293_v31, %s1445_s23 }
 0x1be   :  { %v279_v35 = vpop.f32.mrb[6].mxu0  ;;  %v278_v52 = vadd.f32 %v277_v34, %v209_v41  ;;  %v337_v2 = vmul.f32 %v335_v50, %v329_v57  ;;  %668 = vmatpush1.bf16.msra.mxu0 %v1118_v46 }
 0x1bf   :  { %v280_v36 = vadd.f32 %v279_v35, %v205_v21  ;;  %v281_v37 = vpop.f32.mrb[7].mxu0  ;;  %v294_v38 = vmax.f32 %v276_v33, 0.0  ;;  %v290_v7 = vmul.f32 %v287_v47, %v276_v33 }
 0x1c0   :  { %v326_v58 = vmax.f32 %v278_v52, 0.0  ;;  %v282_v59 = vadd.f32 %v281_v37, %v209_v41 }
 0x1c1   :  { %308 = vrot.lane.b32.xlu1 %v294_v38, %s1445_s23  ;;  %v295_v39 = vmax.f32 %v280_v36, 0.0  ;;  %v291_v15 = vmul.f32 %v287_v47, %v280_v36  ;;  %v1123_v47 = vld [vmem:[#allocation10 + $0x64] ss:$8 sps:$4 sm:$0xff]  }
 0x1c2   :  { %v330_v3 = vmul.f32 %v326_v58, %v326_v58  ;;  %v327_v4 = vmax.f32 %v282_v59, 0.0  ;;  %669 = vmatprep.subr.bf16.mxu0 %v1123_v47 }
 0x1c4   :  { %v338_v10 = vmul.f32 %v335_v50, %v330_v3  ;;  %v331_v11 = vmul.f32 %v327_v4, %v327_v4 }
 0x1c5   :  { %310 = vrot.lane.b32.xlu1 %v295_v39, %s1445_s23 }
 0x1c6   :  { %v339_v19 = vmul.f32 %v335_v50, %v331_v11  ;;  %v1124_v50 = vld [vmem:[#allocation10 + $0x70] ss:$8 sps:$4 sm:$0xff]  }
 0x22b   :  { %v305_v53 = vpop.permute.xlu0 %304 }
 0x22c   :  { %v316_v55 = vmul.f32 %v305_v53, %v299_v48 }
 0x22e   :  { %v320_v60 = vadd.f32 %v316_v55, %v288_v54  ;;  %v355_v54 = vld [vmem:[#allocation13] sm:$0x7] }
 0x22f   :  { %v307_v61 = vpop.permute.xlu0 %306  ;;  %v484_v58 = vrot.slane %v355_v54, %v1705_v40 }
 0x230   :  { %v340_v63 = vadd.f32 %v336_v56, %v320_v60  ;;  %v317_v1 = vmul.f32 %v307_v61, %v299_v48  ;;  %v472_v56 = vrot.slane %v355_v54, %v1698_v17  ;;  %v520_v61 = vrot.slane %v355_v54, %v1708_v45 }
 0x232   :  { %v321_v5 = vadd.f32 %v317_v1, %v289_v62 }
 0x233   :  { %v309_v6 = vpop.permute.xlu1 %308 }
 0x234   :  { %v341_v8 = vadd.f32 %v337_v2, %v321_v5  ;;  %v318_v9 = vmul.f32 %v309_v6, %v299_v48 }
 0x236   :  { %v356_v12 = vpack.c.bf16 %v341_v8, %v340_v63  ;;  %v322_v13 = vadd.f32 %v318_v9, %v290_v7 }
 0x237   :  { %v311_v14 = vpop.permute.xlu1 %310 }
 0x238   :  { %v342_v16 = vadd.f32 %v338_v10, %v322_v13  ;;  %v319_v18 = vmul.f32 %v311_v14, %v299_v48  ;;  %1040 = vmatmul.mubr.msk.bf16.vlgmr.msra.gmra.mrb[0].mxu1 %vm409_vm2, %v356_v12  ;;  %v1121_v48 = vld [vmem:[#allocation10 + $0x60] ss:$8 sps:$4 sm:$0xff]  }
 0x239   :  { %458 = vmatprep.mubr.bf16.mxu1 %v1455_v0  ;;  %670 = vmatpush1.bf16.msra.mxu0 %v1121_v48 }
 0x23a   :  { %v323_v20 = vadd.f32 %v319_v18, %v291_v15  ;;  %671 = vmatprep.subr.bf16.mxu0 %v1126_v49 }
 0x23c   :  { %v343_v21 = vadd.f32 %v339_v19, %v323_v20 }
 0x23d   :  { %672 = vmatpush1.bf16.msra.mxu0 %v1124_v50 }
 0x23e   :  { %v357_v22 = vpack.c.bf16 %v343_v21, %v342_v16 }
 0x240   :  { %1041 = vmatmul.mubr.msk.bf16.gmra.mrb[4].mxu1 %vm409_vm2, %v357_v22 }
 0x30b   :  { %v450_v25 = vpop.f32.mrb[0].mxu1 }
 0x30c   :  { %v451_v26 = vadd.f32 %v450_v25, %v362_v24  ;;  %v452_v27 = vpop.f32.mrb[1].mxu1 }
 0x30d   :  { %v454_v28 = vpop.f32.mrb[2].mxu1  ;;  %v453_v52 = vadd.f32 %v452_v27, %v366_v51 }
 0x30e   :  { %v455_v29 = vadd.f32 %v454_v28, %v362_v24  ;;  %v456_v30 = vpop.f32.mrb[3].mxu1  ;;  %v477_v31 = vmax.f32 %v451_v26, 0.0  ;;  %v473_v1 = vmul.f32 %v472_v56, %v451_v26 }
 0x30f   :  { %v457_v53 = vadd.f32 %v456_v30, %v366_v51  ;;  %v509_v55 = vmax.f32 %v453_v52, 0.0 }
 0x310   :  { %489 = vrot.lane.b32.xlu0 %v477_v31, %s1445_s23  ;;  %v478_v32 = vmax.f32 %v455_v29, 0.0  ;;  %v474_v7 = vmul.f32 %v472_v56, %v455_v29 }
 0x311   :  { %v510_v57 = vmax.f32 %v457_v53, 0.0  ;;  %v513_v60 = vmul.f32 %v509_v55, %v509_v55 }
 0x312   :  { %491 = vrot.lane.b32.xlu1 %v478_v32, %s1445_s23 }
 0x313   :  { %v460_v33 = vpop.f32.mrb[4].mxu1  ;;  %v514_v2 = vmul.f32 %v510_v57, %v510_v57  ;;  %v521_v6 = vmul.f32 %v520_v61, %v513_v60 }
 0x314   :  { %v461_v34 = vadd.f32 %v460_v33, %v362_v24  ;;  %v462_v35 = vpop.f32.mrb[5].mxu1 }
 0x315   :  { %v464_v36 = vpop.f32.mrb[6].mxu1  ;;  %v463_v59 = vadd.f32 %v462_v35, %v366_v51  ;;  %v522_v11 = vmul.f32 %v520_v61, %v514_v2 }
 0x316   :  { %v465_v37 = vadd.f32 %v464_v36, %v362_v24  ;;  %v466_v38 = vpop.f32.mrb[7].mxu1  ;;  %v479_v39 = vmax.f32 %v461_v34, 0.0  ;;  %v475_v18 = vmul.f32 %v472_v56, %v461_v34 }
 0x317   :  { %v467_v62 = vadd.f32 %v466_v38, %v366_v51  ;;  %v511_v4 = vmax.f32 %v463_v59, 0.0 }
 0x318   :  { %493 = vrot.lane.b32.xlu0 %v479_v39, %s1445_s23  ;;  %v480_v41 = vmax.f32 %v465_v37, 0.0  ;;  %v476_v26 = vmul.f32 %v472_v56, %v465_v37 }
 0x319   :  { %v512_v10 = vmax.f32 %v467_v62, 0.0  ;;  %v515_v14 = vmul.f32 %v511_v4, %v511_v4 }
 0x31a   :  { %495 = vrot.lane.b32.xlu1 %v480_v41, %s1445_s23 }
 0x31b   :  { %v516_v19 = vmul.f32 %v512_v10, %v512_v10  ;;  %v523_v25 = vmul.f32 %v520_v61, %v515_v14 }
 0x31d   :  { %v524_v34 = vmul.f32 %v520_v61, %v516_v19 }
 0x382   :  { %v490_v63 = vpop.permute.xlu0 %489 }
 0x383   :  { %v501_v3 = vmul.f32 %v490_v63, %v484_v58 }
 0x384   :  { %v492_v5 = vpop.permute.xlu1 %491 }
 0x385   :  { %v505_v8 = vadd.f32 %v501_v3, %v473_v1  ;;  %v502_v9 = vmul.f32 %v492_v5, %v484_v58 }
 0x387   :  { %v525_v12 = vadd.f32 %v521_v6, %v505_v8  ;;  %v506_v13 = vadd.f32 %v502_v9, %v474_v7  ;;  %v1733_v8 = vld [vmem:[#allocation14] ss:$0 sm:$0xff] }
 0x389   :  { %v543_v15 = vmul.f32 %v525_v12, %v525_v12  ;;  %v526_v16 = vadd.f32 %v522_v11, %v506_v13  ;;  %v529_v21 = vsel %vm409_vm2, %v525_v12, 0.0 }
 0x38a   :  { %v494_v20 = vpop.permute.xlu0 %493 }
 0x38b   :  { %v530_v22 = vsel %vm409_vm2, %v526_v16, 0.0  ;;  %v544_v23 = vmul.f32 %v526_v16, %v526_v16  ;;  %v503_v24 = vmul.f32 %v494_v20, %v484_v58  ;;  %v547_v29 = vsel %vm409_vm2, %v543_v15, 0.0  ;;  %v1739_v15 = vld [vmem:[#allocation16] ss:$0 sm:$0xff] }
 0x38c   :  { %v531_v27 = vadd.f32 %v530_v22, %v529_v21  ;;  %v496_v28 = vpop.permute.xlu1 %495 }
 0x38d   :  { %v548_v30 = vsel %vm409_vm2, %v544_v23, 0.0  ;;  %v507_v31 = vadd.f32 %v503_v24, %v475_v18  ;;  %v504_v32 = vmul.f32 %v496_v28, %v484_v58 }
 0x38e   :  { %v549_v33 = vadd.f32 %v548_v30, %v547_v29 }
 0x38f   :  { %v527_v35 = vadd.f32 %v523_v25, %v507_v31  ;;  %v508_v36 = vadd.f32 %v504_v32, %v476_v26  ;;  %v603_v26 = vld [vmem:[#allocation11 + $0x2] sm:$0x3] }
 0x391   :  { %v532_v38 = vsel %vm409_vm2, %v527_v35, 0.0  ;;  %v545_v39 = vmul.f32 %v527_v35, %v527_v35  ;;  %v528_v41 = vadd.f32 %v524_v34, %v508_v36 }
 0x392   :  { %v533_v42 = vadd.f32 %v532_v38, %v531_v27  ;;  %v612_v27 = vrot.slane %v603_v26, %v1698_v17 }
 0x393   :  { %v550_v43 = vsel %vm409_vm2, %v545_v39, 0.0  ;;  %v534_v37 = vsel %vm409_vm2, %v528_v41, 0.0  ;;  %v546_v44 = vmul.f32 %v528_v41, %v528_v41 }
 0x394   :  { %v551_v46 = vadd.f32 %v550_v43, %v549_v33  ;;  %v535_v47 = vadd.f32 %v534_v37, %v533_v42 }
 0x395   :  { %v552_v48 = vsel %vm409_vm2, %v546_v44, 0.0  ;;  %v1127_v44 = vld [vmem:[#allocation17] sm:$0xff]  }
 0x396   :  { %v536_v49 = vrot.slane %v535_v47, 4  ;;  %v553_v50 = vadd.f32 %v552_v48, %v551_v46  ;;  %1067 = vmatprep.subr.bf16.mxu1 %v1127_v44  ;;  %v1128_v46 = vld [vmem:[#allocation17 + $0x8] sm:$0xff]   ;;  %v1130_v48 = vld [vmem:[#allocation17 + $0x18] sm:$0xff]  }
 0x397   :  { %1068 = vmatpush3.bf16.msra.mxu1 %v1127_v44 }
 0x398   :  { %v537_v51 = vadd.f32 %v536_v49, %v535_v47  ;;  %v554_v52 = vrot.slane %v553_v50, 4  ;;  %1069 = vmatprep.subr.bf16.mxu1 %v1128_v46  ;;  %v1129_v47 = vld [vmem:[#allocation17 + $0x10] sm:$0xff]   ;;  %v616_v49 = vrot.slane %v603_v26, %v1705_v40 }
 0x39a   :  { %v538_v53 = vrot.slane %v537_v51, 2  ;;  %v555_v54 = vadd.f32 %v554_v52, %v553_v50  ;;  %v605_v52 = vld [vmem:[#allocation13 + $0x4] sm:$0x7] }
 0x39b   :  { %1070 = vmatpush3.bf16.msra.mxu1 %v1128_v46 }
 0x39c   :  { %v539_v55 = vadd.f32 %v538_v53, %v537_v51  ;;  %v556_v56 = vrot.slane %v555_v54, 2  ;;  %1071 = vmatprep.subr.bf16.mxu1 %v1129_v47 }
 0x39e   :  { %v540_v57 = vrot.slane %v539_v55, 1  ;;  %v557_v58 = vadd.f32 %v556_v56, %v555_v54  ;;  %v721_v54 = vrot.slane %v605_v52, %v1698_v17  ;;  %v733_v56 = vrot.slane %v605_v52, %v1705_v40 }
 0x39f   :  { %1072 = vmatpush3.bf16.msra.mxu1 %v1129_v47 }
 0x3a0   :  { %v541_v59 = vadd.f32 %v540_v57, %v539_v55  ;;  %v558_v60 = vrot.slane %v557_v58, 1  ;;  %1073 = vmatprep.subr.bf16.mxu1 %v1130_v48 }
 0x3a2   :  { %v542_v61 = vmul.f32 0.03125, %v541_v59  ;;  %v559_v62 = vadd.f32 %v558_v60, %v557_v58  ;;  %v769_v59 = vrot.slane %v605_v52, %v1708_v45 }
 0x3a3   :  { %1074 = vmatpush3.bf16.msra.mxu1 %v1130_v48 }
 0x3a4   :  { %v560_v63 = vmul.f32 0.03125, %v559_v62  ;;  %v561_v1 = vmul.f32 %v542_v61, %v542_v61  ;;  %v566_v2 = vsub.f32 %v528_v41, %v542_v61  ;;  %v563_v3 = vsub.f32 %v525_v12, %v542_v61 }
 0x3a5   :  { %v564_v4 = vsub.f32 %v526_v16, %v542_v61  ;;  %v565_v5 = vsub.f32 %v527_v35, %v542_v61 }
 0x3a6   :  { %v562_v6 = vsub.f32 %v560_v63, %v561_v1  ;;  %v576_v9 = vmul.f32 %v1733_v8, %v566_v2  ;;  %v573_v10 = vmul.f32 %v1733_v8, %v563_v3 }
 0x3a7   :  { %v574_v11 = vmul.f32 %v1733_v8, %v564_v4  ;;  %v575_v13 = vmul.f32 %v1733_v8, %v565_v5 }
 0x3a8   :  { %v577_v7 = vadd.f32 1e-05, %v562_v6 }
 0x3aa   :  { %1131 = vrsqrt.f32 %v577_v7 }
 0x3b4   :  { %v1132_v14 = vpop.eup %1131 }
 0x3b5   :  { %v579_v18 = vmul.f32 %v1132_v14, %v573_v10  ;;  %v580_v12 = vmul.f32 %v1132_v14, %v574_v11  ;;  %v581_v16 = vmul.f32 %v1132_v14, %v575_v13  ;;  %v582_v19 = vmul.f32 %v1132_v14, %v576_v9 }
 0x3b7   :  { %v589_v20 = vadd.f32 %v1739_v15, %v579_v18  ;;  %v590_v21 = vadd.f32 %v1739_v15, %v580_v12  ;;  %v591_v22 = vadd.f32 %v1739_v15, %v581_v16  ;;  %v592_v23 = vadd.f32 %v1739_v15, %v582_v19 }
 0x3b9   :  { %v606_v24 = vpack.c.bf16 %v590_v21, %v589_v20  ;;  %v607_v25 = vpack.c.bf16 %v592_v23, %v591_v22 }
 0x3bb   :  { %1052 = vmatmul.mubr.msk.bf16.vlgmr.msra.gmra.mrb[8].mxu0 %vm409_vm2, %v606_v24 }
 0x3bc   :  { %707 = vmatprep.mubr.bf16.mxu0 %v1455_v0 }
 0x3c3   :  { %1053 = vmatmul.mubr.msk.bf16.gmra.mrb[12].mxu0 %vm409_vm2, %v607_v25 }
 0x48e   :  { %v699_v28 = vpop.f32.mrb[8].mxu0 }
 0x48f   :  { %v700_v29 = vadd.f32 %v699_v28, %v612_v27  ;;  %v701_v30 = vpop.f32.mrb[9].mxu0 }
 0x490   :  { %v703_v31 = vpop.f32.mrb[10].mxu0  ;;  %v702_v50 = vadd.f32 %v701_v30, %v616_v49 }
 0x491   :  { %v704_v32 = vadd.f32 %v703_v31, %v612_v27  ;;  %v705_v33 = vpop.f32.mrb[11].mxu0  ;;  %v726_v34 = vmax.f32 %v700_v29, 0.0  ;;  %v722_v62 = vmul.f32 %v721_v54, %v700_v29 }
 0x492   :  { %v706_v51 = vadd.f32 %v705_v33, %v616_v49  ;;  %v758_v53 = vmax.f32 %v702_v50, 0.0 }
 0x493   :  { %738 = vrot.lane.b32.xlu0 %v726_v34, %s1445_s23  ;;  %v727_v35 = vmax.f32 %v704_v32, 0.0  ;;  %v723_v5 = vmul.f32 %v721_v54, %v704_v32 }
 0x494   :  { %v759_v55 = vmax.f32 %v706_v51, 0.0  ;;  %v762_v58 = vmul.f32 %v758_v53, %v758_v53 }
 0x495   :  { %740 = vrot.lane.b32.xlu1 %v727_v35, %s1445_s23 }
 0x496   :  { %v709_v36 = vpop.f32.mrb[12].mxu0  ;;  %v763_v63 = vmul.f32 %v759_v55, %v759_v55  ;;  %v770_v4 = vmul.f32 %v769_v59, %v762_v58 }
 0x497   :  { %v710_v38 = vadd.f32 %v709_v36, %v612_v27  ;;  %v711_v0 = vpop.f32.mrb[13].mxu0 }
 0x498   :  { %v713_v39 = vpop.f32.mrb[14].mxu0  ;;  %v712_v57 = vadd.f32 %v711_v0, %v616_v49  ;;  %v771_v10 = vmul.f32 %v769_v59, %v763_v63 }
 0x499   :  { %v714_v41 = vadd.f32 %v713_v39, %v612_v27  ;;  %v715_v42 = vpop.f32.mrb[15].mxu0  ;;  %v728_v43 = vmax.f32 %v710_v38, 0.0  ;;  %v724_v16 = vmul.f32 %v721_v54, %v710_v38 }
 0x49a   :  { %v716_v60 = vadd.f32 %v715_v42, %v616_v49  ;;  %v760_v2 = vmax.f32 %v712_v57, 0.0 }
 0x49b   :  { %742 = vrot.lane.b32.xlu0 %v728_v43, %s1445_s23  ;;  %v729_v37 = vmax.f32 %v714_v41, 0.0  ;;  %v725_v26 = vmul.f32 %v721_v54, %v714_v41 }
 0x49c   :  { %v761_v9 = vmax.f32 %v716_v60, 0.0  ;;  %v764_v14 = vmul.f32 %v760_v2, %v760_v2 }
 0x49d   :  { %744 = vrot.lane.b32.xlu1 %v729_v37, %s1445_s23  ;;  %s1457_s23 = smov 96  }
 0x49e   :  { %v765_v19 = vmul.f32 %v761_v9, %v761_v9  ;;  %v772_v25 = vmul.f32 %v769_v59, %v764_v14 }
 0x4a0   :  { %v773_v34 = vmul.f32 %v769_v59, %v765_v19 }
 0x505   :  { %v739_v61 = vpop.permute.xlu0 %738 }
 0x506   :  { %v750_v1 = vmul.f32 %v739_v61, %v733_v56 }
 0x507   :  { %v741_v3 = vpop.permute.xlu1 %740 }
 0x508   :  { %v754_v6 = vadd.f32 %v750_v1, %v722_v62  ;;  %v751_v7 = vmul.f32 %v741_v3, %v733_v56 }
 0x50a   :  { %v774_v11 = vadd.f32 %v770_v4, %v754_v6  ;;  %v755_v13 = vadd.f32 %v751_v7, %v723_v5 }
 0x50c   :  { %v792_v18 = vmul.f32 %v774_v11, %v774_v11  ;;  %v775_v12 = vadd.f32 %v771_v10, %v755_v13  ;;  %v778_v21 = vsel %vm409_vm2, %v774_v11, 0.0 }
 0x50d   :  { %v743_v20 = vpop.permute.xlu0 %742 }
 0x50e   :  { %v779_v22 = vsel %vm409_vm2, %v775_v12, 0.0  ;;  %v793_v23 = vmul.f32 %v775_v12, %v775_v12  ;;  %v752_v24 = vmul.f32 %v743_v20, %v733_v56  ;;  %v796_v29 = vsel %vm409_vm2, %v792_v18, 0.0 }
 0x50f   :  { %v780_v27 = vadd.f32 %v779_v22, %v778_v21  ;;  %v745_v28 = vpop.permute.xlu1 %744 }
 0x510   :  { %v797_v30 = vsel %vm409_vm2, %v793_v23, 0.0  ;;  %v756_v31 = vadd.f32 %v752_v24, %v724_v16  ;;  %v753_v32 = vmul.f32 %v745_v28, %v733_v56 }
 0x511   :  { %v798_v33 = vadd.f32 %v797_v30, %v796_v29 }
 0x512   :  { %v776_v35 = vadd.f32 %v772_v25, %v756_v31  ;;  %v757_v36 = vadd.f32 %v753_v32, %v725_v26 }
 0x514   :  { %v781_v38 = vsel %vm409_vm2, %v776_v35, 0.0  ;;  %v794_v0 = vmul.f32 %v776_v35, %v776_v35  ;;  %v777_v39 = vadd.f32 %v773_v34, %v757_v36 }
 0x515   :  { %v782_v42 = vadd.f32 %v781_v38, %v780_v27 }
 0x516   :  { %v799_v43 = vsel %vm409_vm2, %v794_v0, 0.0  ;;  %v783_v41 = vsel %vm409_vm2, %v777_v39, 0.0  ;;  %v795_v37 = vmul.f32 %v777_v39, %v777_v39 }
 0x517   :  { %v800_v44 = vadd.f32 %v799_v43, %v798_v33  ;;  %v784_v46 = vadd.f32 %v783_v41, %v782_v42  ;;  %v839_v42 = vld [vmem:[#allocation20] sm:$0x7] }
 0x518   :  { %v801_v47 = vsel %vm409_vm2, %v795_v37, 0.0  ;;  %v930_v37 = vrot.slane %v839_v42, %v1698_v17 }
 0x519   :  { %v785_v48 = vrot.slane %v784_v46, 4  ;;  %v802_v49 = vadd.f32 %v801_v47, %v800_v44  ;;  %v942_v44 = vrot.slane %v839_v42, %v1705_v40 }
 0x51b   :  { %v786_v50 = vadd.f32 %v785_v48, %v784_v46  ;;  %v803_v51 = vrot.slane %v802_v49, 4  ;;  %v974_v48 = vrot.slane %v839_v42, %v1708_v45 }
 0x51d   :  { %v787_v52 = vrot.slane %v786_v50, 2  ;;  %v804_v53 = vadd.f32 %v803_v51, %v802_v49 }
 0x51f   :  { %v788_v54 = vadd.f32 %v787_v52, %v786_v50  ;;  %v805_v55 = vrot.slane %v804_v53, 2 }
 0x521   :  { %v789_v56 = vrot.slane %v788_v54, 1  ;;  %v806_v57 = vadd.f32 %v805_v55, %v804_v53 }
 0x523   :  { %v790_v58 = vadd.f32 %v789_v56, %v788_v54  ;;  %v807_v59 = vrot.slane %v806_v57, 1 }
 0x525   :  { %v791_v60 = vmul.f32 0.03125, %v790_v58  ;;  %v808_v61 = vadd.f32 %v807_v59, %v806_v57 }
 0x527   :  { %v809_v62 = vmul.f32 0.03125, %v808_v61  ;;  %v810_v63 = vmul.f32 %v791_v60, %v791_v60  ;;  %v814_v1 = vsub.f32 %v776_v35, %v791_v60  ;;  %v815_v2 = vsub.f32 %v777_v39, %v791_v60 }
 0x528   :  { %v812_v3 = vsub.f32 %v774_v11, %v791_v60  ;;  %v813_v4 = vsub.f32 %v775_v12, %v791_v60 }
 0x529   :  { %v811_v5 = vsub.f32 %v809_v62, %v810_v63  ;;  %v818_v7 = vmul.f32 %v1733_v8, %v814_v1  ;;  %v819_v9 = vmul.f32 %v1733_v8, %v815_v2 }
 0x52a   :  { %v816_v10 = vmul.f32 %v1733_v8, %v812_v3  ;;  %v817_v13 = vmul.f32 %v1733_v8, %v813_v4  ;;  %v1054_v8 = vld [vmem:[#allocation19] ss:$0 sm:$0xff] }
 0x52b   :  { %v820_v6 = vadd.f32 1e-05, %v811_v5 }
 0x52d   :  { %1133 = vrsqrt.f32 %v820_v6 }
 0x537   :  { %v1134_v14 = vpop.eup %1133 }
 0x538   :  { %v824_v18 = vmul.f32 %v1134_v14, %v818_v7  ;;  %v825_v16 = vmul.f32 %v1134_v14, %v819_v9  ;;  %v822_v19 = vmul.f32 %v1134_v14, %v816_v10  ;;  %v823_v20 = vmul.f32 %v1134_v14, %v817_v13 }
 0x53a   :  { %v828_v21 = vadd.f32 %v1739_v15, %v824_v18  ;;  %v829_v11 = vadd.f32 %v1739_v15, %v825_v16  ;;  %v826_v12 = vadd.f32 %v1739_v15, %v822_v19  ;;  %v827_v22 = vadd.f32 %v1739_v15, %v823_v20 }
 0x53c   :  { %v841_v23 = vpack.c.bf16 %v829_v11, %v828_v21  ;;  %v840_v24 = vpack.c.bf16 %v827_v22, %v826_v12 }
 0x53e   :  { %1075 = vmatprep.mubr.msk.bf16.mxu1 %vm409_vm2, %v840_v24 }
 0x53f   :  { %1076 = vmatmul.mubr.msk.bf16.vlgmr.msra.gmra.mrb[8].mxu1 %vm409_vm2, %v841_v23 }
 0x612   :  { %v1077_v25 = vpop.f32.mrb[8].mxu1 }
 0x613   :  { %v921_v26 = vadd.f32 %v1077_v25, %v1054_v8  ;;  %v912_v27 = vpop.f32.mrb[9].mxu1 }
 0x614   :  { %v1078_v28 = vpop.f32.mrb[10].mxu1  ;;  %v913_v30 = vadd.f32 %v1054_v8, %v912_v27 }
 0x615   :  { %v937_v29 = vmax.f32 %v921_v26, 0.0  ;;  %v924_v31 = vadd.f32 %v1078_v28, %v1054_v8  ;;  %v915_v32 = vpop.f32.mrb[11].mxu1  ;;  %v933_v57 = vmul.f32 %v930_v37, %v921_v26 }
 0x616   :  { %v916_v34 = vadd.f32 %v1054_v8, %v915_v32  ;;  %v935_v15 = vmax.f32 %v913_v30, 0.0  ;;  %v931_v50 = vmul.f32 %v930_v37, %v913_v30 }
 0x617   :  { %v938_v33 = vmax.f32 %v924_v31, 0.0  ;;  %951 = vrot.lane.b32.xlu0 %v937_v29, %s1456_s11  ;;  %v969_v0 = vmul.f32 %v937_v29, %v937_v29  ;;  %v934_v62 = vmul.f32 %v930_v37, %v924_v31 }
 0x618   :  { %v936_v35 = vmax.f32 %v916_v34, 0.0  ;;  %v967_v36 = vmul.f32 %v935_v15, %v935_v15  ;;  %v932_v53 = vmul.f32 %v930_v37, %v916_v34 }
 0x619   :  { %953 = vrot.lane.b32.xlu1 %v938_v33, %s1456_s11  ;;  %v970_v39 = vmul.f32 %v938_v33, %v938_v33 }
 0x61a   :  { %v968_v38 = vmul.f32 %v936_v35, %v936_v35 }
 0x61b   :  { %947 = vrot.lane.b32.xlu0 %v935_v15, %s1456_s11 }
 0x61d   :  { %949 = vrot.lane.b32.xlu1 %v936_v35, %s1456_s11 }
 0x61f   :  { %979 = vrot.lane.b32.xlu0 %v967_v36, %s1457_s23 }
 0x621   :  { %981 = vrot.lane.b32.xlu1 %v968_v38, %s1457_s23 }
 0x623   :  { %983 = vrot.lane.b32.xlu0 %v969_v0, %s1457_s23 }
 0x625   :  { %985 = vrot.lane.b32.xlu1 %v970_v39, %s1457_s23 }
 0x689   :  { %v952_v43 = vpop.permute.xlu0 %951 }
 0x68a   :  { %v961_v54 = vmul.f32 %v952_v43, %v942_v44 }
 0x68b   :  { %v954_v41 = vpop.permute.xlu1 %953 }
 0x68c   :  { %v962_v59 = vmul.f32 %v954_v41, %v942_v44  ;;  %v965_v63 = vadd.f32 %v961_v54, %v933_v57 }
 0x68d   :  { %v948_v46 = vpop.permute.xlu0 %947 }
 0x68e   :  { %v959_v47 = vmul.f32 %v948_v46, %v942_v44  ;;  %v966_v3 = vadd.f32 %v962_v59, %v934_v62 }
 0x68f   :  { %v950_v49 = vpop.permute.xlu1 %949 }
 0x690   :  { %v960_v51 = vmul.f32 %v950_v49, %v942_v44  ;;  %v963_v55 = vadd.f32 %v959_v47, %v931_v50 }
 0x691   :  { %v980_v52 = vpop.permute.xlu0 %979 }
 0x692   :  { %v991_v56 = vmul.f32 %v980_v52, %v974_v48  ;;  %v964_v60 = vadd.f32 %v960_v51, %v932_v53 }
 0x693   :  { %v982_v58 = vpop.permute.xlu1 %981 }
 0x694   :  { %v995_v17 = vadd.f32 %v991_v56, %v963_v55  ;;  %v992_v61 = vmul.f32 %v982_v58, %v974_v48 }
 0x695   :  { %v984_v40 = vpop.permute.xlu0 %983 }
 0x696   :  { %1000 = vst.msk [vmem:[#allocation22] sm:$0xff] %vm999_vm3, %v995_v17  ;;  %v996_v45 = vadd.f32 %v992_v61, %v964_v60  ;;  %v993_v1 = vmul.f32 %v984_v40, %v974_v48 }
 0x697   :  { %v986_v2 = vpop.permute.xlu1 %985 }
 0x698   :  { %1001 = vst.msk [vmem:[#allocation22 + $0x8] sm:$0xff] %vm999_vm3, %v996_v45  ;;  %v997_v4 = vadd.f32 %v993_v1, %v965_v63  ;;  %v994_v5 = vmul.f32 %v986_v2, %v974_v48 }
 0x69a   :  { %1002 = vst.msk [vmem:[#allocation22 + $0x10] sm:$0xff] %vm999_vm3, %v997_v4  ;;  %v998_v6 = vadd.f32 %v994_v5, %v966_v3 }
 0x69c   :  { %1003 = vst.msk [vmem:[#allocation22 + $0x18] sm:$0xff] %vm999_vm3, %v998_v6 }
 0x69d   :  { %1410 = shalt.err (!%p1407_p2)
}
 0x69e   :  { %s1411_s13 = scalar_lea.hbm %s1809_s12, 512 }
 0x69f   :  { %p1412_p3 = scmp.ne.s32.totalorder %s1809_s12, %s1411_s13  ;;  %p1415_p4 = scmp.lt.u32.totalorder %s1411_s13, %s1809_s12 }
 0x6a1   :  { %p1417_p5 = pnand %p1415_p4, %p1412_p3 }
 0x6a3   :  { %1420 = shalt.err (!%p1417_p5)
}
 0x6a4   :  { %1015 = dma.vmem_to_hbm [thread:$0]  %s1010_s7, 512, %s1809_s12, [#allocation4], %s1447_s9, %s1447_s9, %s1448_s16  }
 0x6a5   :  { %1435 = dma.done.wait [#allocation4], 512  }
 0x6a6   :  { %1436 = vsyncadd [#allocation4], 4294966784 }
 0x6a7   :  { %1019 = vsyncpa [#allocation3], 1 }
 0x6a8   :  { %1020 = vsyncpa [#allocation6], 1 }
 0x6a9   :  { %1021 = vsyncpa [#allocation9], 1 }
 0x6aa   :  { %1022 = vsyncpa [#allocation12], 1 }
 0x6ab   :  { %1023 = vsyncpa [#allocation15], 1 }
 0x6ac   :  { %1024 = vsyncpa [#allocation18], 1 }
 0x6ad   :  { %1025 = vsyncpa [#allocation21], 1 }
 0x6ae   :  { %1026 = vsyncpa [#allocation4], 1 }

</bundles_post_ra>
